<compile_context>
chip_gen: v6e
topology: v6e:2x2x1
jax: 0.10.0
libtpu: 0.0.40
codegen_flags: <defaults>
</compile_context>

<pallas_src>
import numpy as np
import jax
import jax.numpy as jnp
from jax import lax
from jax.experimental import pallas as pl
from jax.experimental.pallas import tpu as pltpu


def _round_up(x, m):
    return ((x + m - 1) // m) * m


def _largest_div_tile(total, cap, quantum=128):
    """Largest multiple-of-`quantum` divisor of `total` that is <= cap."""
    best = quantum
    d = quantum
    while d <= min(total, cap):
        if total % d == 0:
            best = d
        d += quantum
    return best


# ----------------------------- Pallas kernels ------------------------------

def _wgen_kernel(xm_ref, wredT_ref, bred_ref, wfc1T_ref, bfc1_ref, wfc2T_ref,
                 o_ref):
    # xm_ref: (B, C) per-sample channel means; wfc2T_ref: one column tile of
    # the permuted/padded dense fc2 matrix.  gap/act are tiny, recomputed per
    # column tile (cheaper than an init-once scratch, and megacore-safe).
    gap = jnp.dot(xm_ref[...], wredT_ref[...],
                  preferred_element_type=jnp.float32) + bred_ref[...]
    act = jax.nn.sigmoid(
        jnp.dot(gap, wfc1T_ref[...], preferred_element_type=jnp.float32)
        + bfc1_ref[...])
    o_ref[...] = jnp.dot(act, wfc2T_ref[...],
                         preferred_element_type=jnp.float32).astype(o_ref.dtype)


def _make_dynconv_kernel(offsets, tile_q, C, KC, n_outer):
    """Fused im2col + dynamic conv (stride-1 flat-shift formulation).

    Grid = (B * n_outer, n_inner); axis 0 "parallel", axis 1 "arbitrary".
    Double-buffered im2col slab: the K shifted-window DMAs for inner step n+1
    are issued while step n's fused matmul runs.
    """
    K = len(offsets)

    def kernel(w_ref, x_hbm, o_ref, slab, sem):
        # w_ref: (1, oup, KC_pad) VMEM (per-sample dynamic weight, lane-dense)
        # x_hbm: (B, C, L_pad)    HBM  (raw ref, manual DMA)
        # o_ref: (1, oup, tile_q) VMEM
        # slab:  (2, KC, tile_q)  VMEM scratch (double-buffered im2col slab)
        # sem:   DMA semaphores, shape (2,)  (one shared per slab slot)
        m = pl.program_id(0)
        n = pl.program_id(1)
        n_inner = pl.num_programs(1)
        b = m // n_outer
        t_base = (m % n_outer) * n_inner
        slot = n % 2

        def window_copies(n_local, s):
            # K DMAs: shifted (C, tile_q) windows -> slab rows [k*C, (k+1)*C).
            start = pl.multiple_of((t_base + n_local) * tile_q, 128)
            return [
                pltpu.make_async_copy(
                    x_hbm.at[b, :, pl.ds(start + offsets[k], tile_q)],
                    slab.at[s, pl.ds(k * C, C), :],
                    sem.at[s])
                for k in range(K)
            ]

        # Prologue: first inner step of this (batch, outer-chunk) fetches its
        # own window; later steps were prefetched by the previous step.
        @pl.when(n == 0)
        def _():
            for cp in window_copies(n, slot):
                cp.start()

        # Wait for the K shifted-window DMAs of the current slot.
        for cp in window_copies(n, slot):
            cp.wait()

        # Prefetch the next inner step's window into the other slot; overlaps
        # with the fused matmul + output writeback below.
        @pl.when(n + 1 < n_inner)
        def _():
            for cp in window_copies(n + 1, 1 - slot):
                cp.start()

        # ONE fused (oup, K*C) @ (K*C, tile_q) MXU matmul, written straight to
        # the lane-dense output block (no K-way unrolled accumulator).
        w = w_ref[0][:, :KC]                     # drop zero-padded lanes
        o_ref[0] = jnp.dot(w, slab[slot],
                           preferred_element_type=jnp.float32
                           ).astype(o_ref.dtype)

    return kernel


# ------------------------------ Module wrapper ------------------------------

class MHNPallas:
    def __init__(self, inp, oup, kernel_size, stride, padding, M=2, G=2,
                 key=None):
        self.inp, self.oup = inp, oup
        self.ksize, self.stride, self.padding = kernel_size, stride, padding
        self.M, self.G = M, G
        self.inp_gap = max(16, inp // 16)
        self.K = kernel_size[0] * kernel_size[1] * kernel_size[2]
        self.out_total = oup * inp * self.K
        self.KC = inp * self.K
        self.KC_pad = _round_up(self.KC, 128)

        groups = G * oup
        # fail loudly for group configs that would mis-build the block-diagonal
        assert (M * oup) % groups == 0, "M*oup must be divisible by G*oup"
        assert self.out_total % groups == 0, "oup*inp*K must be divisible by G*oup"
        ipg = (M * oup) // groups          # input channels per group
        opg = self.out_total // groups     # output channels per group

        key = jax.random.PRNGKey(0) if key is None else key
        k1, k2, k3, k4, k5 = jax.random.split(key, 5)
        s = 0.1
        # reduce: Conv3d(inp -> inp_gap, 1x1x1, bias=True)
        w_reduce = np.asarray(jax.random.normal(k1, (self.inp_gap, inp),
                                                jnp.float32)) * s
        b_reduce = np.asarray(jax.random.normal(k2, (self.inp_gap,),
                                                jnp.float32)) * s
        # wn_fc1: Conv3d(inp_gap -> M*oup, 1x1x1, bias=True)
        w_fc1 = np.asarray(jax.random.normal(k3, (M * oup, self.inp_gap),
                                             jnp.float32)) * s
        b_fc1 = np.asarray(jax.random.normal(k4, (M * oup,), jnp.float32)) * s
        # wn_fc2: Conv3d(M*oup -> oup*inp*K, 1x1x1, groups=G*oup, bias=False)
        w_fc2 = np.asarray(jax.random.normal(k5, (self.out_total, ipg),
                                             jnp.float32)) * s

        # Dense-expanded (block-diagonal) version of the grouped 1x1x1 conv.
        dense = np.zeros((self.out_total, M * oup), np.float32)
        for g in range(groups):
            dense[g * opg:(g + 1) * opg, g * ipg:(g + 1) * ipg] = \
                w_fc2[g * opg:(g + 1) * opg, :]

        # parameters used by the pure-JAX reference
        self.w_reduce = jnp.asarray(w_reduce)
        self.b_reduce = jnp.asarray(b_reduce)
        self.w_fc1 = jnp.asarray(w_fc1)
        self.b_fc1 = jnp.asarray(b_fc1)
        self.w_fc2_dense = jnp.asarray(dense)

        # ---- pre-transposed operands for kernel A ----
        self.wredT = jnp.asarray(w_reduce.T)            # (C, Cg)
        self.bred = jnp.asarray(b_reduce[None, :])      # (1, Cg)
        self.wfc1T = jnp.asarray(w_fc1.T)               # (Cg, M*oup)
        self.bfc1 = jnp.asarray(b_fc1[None, :])         # (1, M*oup)

        # Permute fc2's output columns into per-oup (k, c) blocks, each padded
        # with zero columns to KC_pad lanes, so kernel A emits the dynamic
        # weight directly in the lane-dense (B, oup, KC_pad) layout kernel B
        # consumes (a free reshape, no slice / transpose / XLA copy).
        K, C = self.K, inp
        perm = np.zeros((M * oup, oup * self.KC_pad), np.float32)
        o_i, k_i, c_i = np.meshgrid(np.arange(oup), np.arange(K),
                                    np.arange(C), indexing="ij")
        dst = (o_i * self.KC_pad + k_i * C + c_i).reshape(-1)
        src = (o_i * C * K + c_i * K + k_i).reshape(-1)     # PyTorch (o,c,k) order
        perm[:, dst] = dense[src, :].T
        self.wfc2T_perm = jnp.asarray(perm)                 # (M*oup, oup*KC_pad)

    def __call__(self, x):
        B, C, T, H, W = x.shape
        assert C == self.inp
        kd, kh, kw = self.ksize
        sd, sh, sw = self.stride
        pd, ph, pw = self.padding
        Tp, Hp, Wp = T + 2 * pd, H + 2 * ph, W + 2 * pw
        # stride-1 "full plane" output extents (computed, then subsampled)
        To1, Ho1, Wo1 = Tp - kd + 1, Hp - kh + 1, Wp - kw + 1
        # requested (strided) output extents
        To = (T + 2 * pd - kd) // sd + 1
        Ho = (H + 2 * ph - kh) // sh + 1
        Wo = (W + 2 * pw - kw) // sw + 1
        K, KC, KC_pad = self.K, self.KC, self.KC_pad

        # -------------------- kernel A: dynamic weights --------------------
        xm = jnp.mean(x, axis=(2, 3, 4))                  # (B, C), no transpose
        Wtot = self.oup * KC_pad
        col_tile = _largest_div_tile(Wtot, 2048)
        n_col = Wtot // col_tile
        wgen = pl.pallas_call(
            _wgen_kernel,
            out_shape=jax.ShapeDtypeStruct((B, Wtot), jnp.float32),
            grid=(n_col,),
            in_specs=[
                pl.BlockSpec((B, C), lambda j: (0, 0)),
                pl.BlockSpec((C, self.inp_gap), lambda j: (0, 0)),
                pl.BlockSpec((1, self.inp_gap), lambda j: (0, 0)),
                pl.BlockSpec((self.inp_gap, self.M * self.oup), lambda j: (0, 0)),
                pl.BlockSpec((1, self.M * self.oup), lambda j: (0, 0)),
                pl.BlockSpec((self.M * self.oup, col_tile), lambda j: (0, j)),
            ],
            out_specs=pl.BlockSpec((B, col_tile), lambda j: (0, j)),
            compiler_params=pltpu.CompilerParams(
                dimension_semantics=("parallel",),
                vmem_limit_bytes=32 * 1024 * 1024),
        )(xm, self.wredT, self.bred, self.wfc1T, self.bfc1, self.wfc2T_perm)
        # (B, oup*KC_pad) -> (B, oup, KC_pad): last dim contiguous => free.
        w_dyn = wgen.reshape(B, self.oup, KC_pad)

        # ------------- kernel B: fused im2col + dynamic conv -------------
        Q_full = To1 * Hp * Wp                            # full-plane flat outputs
        tile_q = min(4096, _round_up(Q_full, 128))        # lane-dense output tile
        n_need = -(-Q_full // tile_q)
        n_outer = 1
        if B == 1:
            # make sure both v7x TensorCores get work when there is one batch
            if n_need == 1 and Q_full > 128:
                tile_q = _round_up(-(-Q_full // 2), 128)
                n_need = -(-Q_full // tile_q)
            n_outer = 2 if n_need >= 2 else 1
        n_inner = -(-n_need // n_outer)
        n_tiles = n_outer * n_inner

        s_max = (kd - 1) * Hp * Wp + (kh - 1) * Wp + (kw - 1)
        offsets = tuple(dk * Hp * Wp + hk * Wp + wk
                        for dk in range(kd)
                        for hk in range(kh)
                        for wk in range(kw))

        L = Tp * Hp * Wp
        L_need = n_tiles * tile_q + s_max
        # Single fused pad: extend the depth dim so the flattened length also
        # covers the last tile's halo (instead of a second jnp.pad pass).
        extra_d = max(0, -(-(L_need - L) // (Hp * Wp)))
        xp = jnp.pad(x, ((0, 0), (0, 0), (pd, pd + extra_d), (ph, ph), (pw, pw)))
        L_pad = (Tp + extra_d) * Hp * Wp
        x_flat = xp.reshape(B, C, L_pad)

        dynconv = _make_dynconv_kernel(offsets, tile_q, C, KC, n_outer)
        out_flat = pl.pallas_call(
            dynconv,
            out_shape=jax.ShapeDtypeStruct((B, self.oup, n_tiles * tile_q),
                                           jnp.float32),
            grid=(B * n_outer, n_inner),
            in_specs=[
                pl.BlockSpec((1, self.oup, KC_pad),
                             lambda m, n: (m // n_outer, 0, 0)),
                pl.BlockSpec(memory_space=pl.ANY),        # padded input, raw HBM
            ],
            out_specs=pl.BlockSpec(
                (1, self.oup, tile_q),
                lambda m, n: (m // n_outer, 0, (m % n_outer) * n_inner + n)),
            scratch_shapes=[
                pltpu.VMEM((2, KC, tile_q), jnp.float32),  # double-buffered slab
                pltpu.SemaphoreType.DMA((2,)),
            ],
            compiler_params=pltpu.CompilerParams(
                dimension_semantics=("parallel", "arbitrary"),
                vmem_limit_bytes=32 * 1024 * 1024),
        )(w_dyn, x_flat)

        # Full-plane positions whose (h, w) lies in the padded border (and the
        # tail of the last, partially-used tile) are wrap-around garbage by
        # construction; the reshape + slice below discards exactly those, and
        # the strided subsample keeps only valid rows.
        out5 = out_flat[:, :, :Q_full].reshape(B, self.oup, To1, Hp, Wp)
        out = out5[:, :, ::sd, ::sh, ::sw][:, :, :To, :Ho, :Wo]
        return out


# ---------------------- pure-JAX reference (for checking) -------------------

def reference_forward(m, x):
    B = x.shape[0]
    xm = x.mean(axis=(2, 3, 4))                              # (B, C)
    gap = xm @ m.w_reduce.T + m.b_reduce                     # (B, Cg)
    act = jax.nn.sigmoid(gap @ m.w_fc1.T + m.b_fc1)          # (B, M*oup)
    wflat = act @ m.w_fc2_dense.T                            # (B, OT) in (o,c,k)
    kd, kh, kw = m.ksize
    w = wflat.reshape(B, m.oup, m.inp, kd, kh, kw)
    outs = []
    for b in range(B):
        o = lax.conv_general_dilated(
            x[b:b + 1], w[b],
            window_strides=m.stride,
            padding=[(p, p) for p in m.padding],
            dimension_numbers=('NCDHW', 'OIDHW', 'NCDHW'))
        outs.append(o)
    return jnp.concatenate(outs, axis=0)


# ----------------------------------- main ------------------------------------

if __name__ == "__main__":
    key = jax.random.PRNGKey(0)
    cases = [
        # (B, C,  T,  H,  W, oup, ksize,     stride,    padding)
        (2, 4,  8,  8,  8, 4, (3, 3, 3), (1, 1, 1), (1, 1, 1)),  # base case
        (1, 4, 12, 16, 16, 4, (3, 3, 3), (2, 2, 2), (1, 1, 1)),  # B==1 split + stride
        (2, 4, 12, 20, 20, 4, (3, 3, 3), (1, 1, 1), (1, 1, 1)),  # multi-tile prefetch
    ]
    for i, (B, C, T, H, W, oup, ks, st, pad) in enumerate(cases):
        kx, kp = jax.random.split(jax.random.fold_in(key, i))
        x = jax.random.normal(kx, (B, C, T, H, W), jnp.float32)
        mhn = MHNPallas(inp=C, oup=oup, kernel_size=ks, stride=st, padding=pad,
                        M=2, G=2, key=kp)

        out = jax.block_until_ready(mhn(x))
        To = (T + 2 * pad[0] - ks[0]) // st[0] + 1
        Ho = (H + 2 * pad[1] - ks[1]) // st[1] + 1
        Wo = (W + 2 * pad[2] - ks[2]) // st[2] + 1
        assert out.shape == (B, oup, To, Ho, Wo), (i, out.shape)

        ref = reference_forward(mhn, x)
        if not jnp.allclose(out, ref, atol=1e-3, rtol=1e-3):
            raise AssertionError(
                f"case {i}: mismatch, max abs err = "
                f"{float(jnp.max(jnp.abs(out - ref)))}")

    print("KERNEL_OK")
</pallas_src>

<mosaic_0001>
module attributes {stable_mosaic.version = 11 : i64} {
  func.func @_wgen_kernel(%arg0: i32, %arg1: memref<2x4xf32, #tpu.memory_space<vmem>>, %arg2: memref<4x16xf32, #tpu.memory_space<vmem>>, %arg3: memref<1x16xf32, #tpu.memory_space<vmem>>, %arg4: memref<16x8xf32, #tpu.memory_space<vmem>>, %arg5: memref<1x8xf32, #tpu.memory_space<vmem>>, %arg6: memref<8x512xf32, #tpu.memory_space<vmem>>, %arg7: memref<2x512xf32, #tpu.memory_space<vmem>>) attributes {dimension_semantics = [#tpu.dimension_semantics<parallel>], iteration_bounds = array<i64: 1>, scalar_prefetch = 0 : i64, scratch_operands = 0 : i64, tpu.core_type = #tpu.core_type<tc>, window_params = [{pipeline_mode = #tpu.pipeline_mode<synchronous>, transform_indices = @transform_0, window_bounds = array<i64: 2, 4>}, {pipeline_mode = #tpu.pipeline_mode<synchronous>, transform_indices = @transform_1, window_bounds = array<i64: 4, 16>}, {pipeline_mode = #tpu.pipeline_mode<synchronous>, transform_indices = @transform_2, window_bounds = array<i64: 1, 16>}, {pipeline_mode = #tpu.pipeline_mode<synchronous>, transform_indices = @transform_3, window_bounds = array<i64: 16, 8>}, {pipeline_mode = #tpu.pipeline_mode<synchronous>, transform_indices = @transform_4, window_bounds = array<i64: 1, 8>}, {transform_indices = @transform_5, window_bounds = array<i64: 8, 512>}, {transform_indices = @transform_6, window_bounds = array<i64: 2, 512>}]} {
    %c0 = arith.constant 0 : index
    %c0_0 = arith.constant 0 : index
    %0 = vector.load %arg1[%c0, %c0_0] : memref<2x4xf32, #tpu.memory_space<vmem>>, vector<2x4xf32>
    %c0_1 = arith.constant 0 : index
    %c0_2 = arith.constant 0 : index
    %1 = vector.load %arg2[%c0_1, %c0_2] : memref<4x16xf32, #tpu.memory_space<vmem>>, vector<4x16xf32>
    %cst = arith.constant dense<0.000000e+00> : vector<2x16xf32>
    %2 = tpu.matmul %0, %1, %cst {dimension_numbers = #tpu.dot_dimension_numbers<[1], [0], [0], [1], [0, 0, 1, 1], [], []>} : vector<2x4xf32>, vector<4x16xf32>, vector<2x16xf32> -> vector<2x16xf32>
    %c0_3 = arith.constant 0 : index
    %c0_4 = arith.constant 0 : index
    %3 = vector.load %arg3[%c0_3, %c0_4] : memref<1x16xf32, #tpu.memory_space<vmem>>, vector<1x16xf32>
    %4 = vector.broadcast %3 : vector<1x16xf32> to vector<2x16xf32>
    %5 = arith.addf %2, %4 : vector<2x16xf32>
    %c0_5 = arith.constant 0 : index
    %c0_6 = arith.constant 0 : index
    %6 = vector.load %arg4[%c0_5, %c0_6] : memref<16x8xf32, #tpu.memory_space<vmem>>, vector<16x8xf32>
    %cst_7 = arith.constant dense<0.000000e+00> : vector<2x8xf32>
    %7 = tpu.matmul %5, %6, %cst_7 {dimension_numbers = #tpu.dot_dimension_numbers<[1], [0], [0], [1], [0, 0, 1, 1], [], []>} : vector<2x16xf32>, vector<16x8xf32>, vector<2x8xf32> -> vector<2x8xf32>
    %c0_8 = arith.constant 0 : index
    %c0_9 = arith.constant 0 : index
    %8 = vector.load %arg5[%c0_8, %c0_9] : memref<1x8xf32, #tpu.memory_space<vmem>>, vector<1x8xf32>
    %9 = vector.broadcast %8 : vector<1x8xf32> to vector<2x8xf32>
    %10 = arith.addf %7, %9 : vector<2x8xf32>
    %11 = arith.negf %10 : vector<2x8xf32>
    %12 = math.exp %11 : vector<2x8xf32>
    %cst_10 = arith.constant 1.000000e+00 : f32
    %13 = vector.broadcast %cst_10 : f32 to vector<2x8xf32>
    %14 = arith.addf %13, %12 : vector<2x8xf32>
    %15 = arith.divf %13, %14 : vector<2x8xf32>
    %c0_11 = arith.constant 0 : index
    %c0_12 = arith.constant 0 : index
    %16 = vector.load %arg6[%c0_11, %c0_12] : memref<8x512xf32, #tpu.memory_space<vmem>>, vector<8x512xf32>
    %cst_13 = arith.constant dense<0.000000e+00> : vector<2x512xf32>
    %17 = tpu.matmul %15, %16, %cst_13 {dimension_numbers = #tpu.dot_dimension_numbers<[1], [0], [0], [1], [0, 0, 1, 1], [], []>} : vector<2x8xf32>, vector<8x512xf32>, vector<2x512xf32> -> vector<2x512xf32>
    %c0_14 = arith.constant 0 : index
    %c0_15 = arith.constant 0 : index
    %18 = vector.load %arg7[%c0_14, %c0_15] : memref<2x512xf32, #tpu.memory_space<vmem>>, vector<2x512xf32>
    tpu.vector_store %arg7[%c0_14, %c0_15], %17 {strides = array<i32>} : memref<2x512xf32, #tpu.memory_space<vmem>>, vector<2x512xf32>,
    return
  }
  func.func @transform_0(%arg0: i32) -> (i32, i32) {
    %c0_i32 = arith.constant 0 : i32
    %c0_i32_0 = arith.constant 0 : i32
    %c0_i32_1 = arith.constant 0 : i32
    return %c0_i32, %c0_i32_0 : i32, i32
  }
  func.func @transform_1(%arg0: i32) -> (i32, i32) {
    %c0_i32 = arith.constant 0 : i32
    %c0_i32_0 = arith.constant 0 : i32
    %c0_i32_1 = arith.constant 0 : i32
    return %c0_i32, %c0_i32_0 : i32, i32
  }
  func.func @transform_2(%arg0: i32) -> (i32, i32) {
    %c0_i32 = arith.constant 0 : i32
    %c0_i32_0 = arith.constant 0 : i32
    %c0_i32_1 = arith.constant 0 : i32
    return %c0_i32, %c0_i32_0 : i32, i32
  }
  func.func @transform_3(%arg0: i32) -> (i32, i32) {
    %c0_i32 = arith.constant 0 : i32
    %c0_i32_0 = arith.constant 0 : i32
    %c0_i32_1 = arith.constant 0 : i32
    return %c0_i32, %c0_i32_0 : i32, i32
  }
  func.func @transform_4(%arg0: i32) -> (i32, i32) {
    %c0_i32 = arith.constant 0 : i32
    %c0_i32_0 = arith.constant 0 : i32
    %c0_i32_1 = arith.constant 0 : i32
    return %c0_i32, %c0_i32_0 : i32, i32
  }
  func.func @transform_5(%arg0: i32) -> (i32, i32) {
    %c0_i32 = arith.constant 0 : i32
    %c0_i32_0 = arith.constant 0 : i32
    return %c0_i32, %arg0 : i32, i32
  }
  func.func @transform_6(%arg0: i32) -> (i32, i32) {
    %c0_i32 = arith.constant 0 : i32
    %c0_i32_0 = arith.constant 0 : i32
    return %c0_i32, %arg0 : i32, i32
  }
}

</mosaic_0001>

<bundles_post_ra>
// kernel: tpu_custom_call.1
= control target key start
LH: loop header
LB: loop body
LE: loop exit
PB: predicated region body
PF: predicated region fallthrough
CT: control target
= control target key end

     0   :  { %11 = vsyncpa [#allocation3], 0  ;;  %s621_s0 = inlined_call_operand.hbm [shape: f32[2,4], index: 0, kind: input, shape index: {}]   ;;  %s622_s1 = inlined_call_operand.hbm [shape: f32[4,16], index: 1, kind: input, shape index: {}]   ;;  %s623_s2 = inlined_call_operand.vmem [shape: f32[1,16], index: 2, kind: input, shape index: {}]   ;;  %s624_s3 = inlined_call_operand.vmem [shape: f32[16,8], index: 3, kind: input, shape index: {}]   ;;  %s625_s4 = inlined_call_operand.hbm [shape: f32[1,8], index: 4, kind: input, shape index: {}]   ;;  %s626_s5 = inlined_call_operand.vmem [shape: f32[8,512], index: 5, kind: input, shape index: {}]   ;;  %s627_s6 = inlined_call_operand.hbm [shape: f32[2,512], index: 6, kind: output, shape index: {}]  }
   0x1   :  { %12 = vsyncpa [#allocation6], 0 }
   0x2   :  { %13 = vsyncpa [#allocation4], 0  ;;  %s546_s21 = smov [#allocation5]   ;;  %s547_s23 = smov [#allocation2]  }
   0x3   :  { %s30_s22 = sshll.u32 %s546_s21, 4  ;;  %s20_s24 = sshll.u32 %s547_s23, 4  ;;  %s31_s22 = int_to_ptr.vmem [resolvable:$true] %s30_s22  ;;  %s21_s24 = int_to_ptr.vmem [resolvable:$true] %s20_s24 }
   0x4   :  { %s468_s25 = scalar_lea.vmem %s31_s22, 64  ;;  %p473_p1 = scmp.lt.s32.totalorder %s31_s22, %s31_s22 }
   0x5   :  { %p469_p0 = scmp.ne.s32.totalorder %s31_s22, %s468_s25  ;;  %p474_p2 = scmp.lt.s32.totalorder %s468_s25, %s468_s25 }
   0x7   :  { %p475_p3 = por %p474_p2, %p473_p1 }
   0x9   :  { %p476_p4 = pnand %p475_p3, %p469_p0 }
   0xb   :  { %479 = shalt.err (!%p476_p4)
}
   0xc   :  { %33 = dma.hbm_to_vmem [thread:$0]  %s622_s1, 64, %s31_s22, [#allocation6]  }
   0xd   :  { %s488_s28 = scalar_lea.vmem %s21_s24, 32  ;;  %p493_p6 = scmp.lt.s32.totalorder %s21_s24, %s21_s24 }
   0xe   :  { %p489_p5 = scmp.ne.s32.totalorder %s21_s24, %s488_s28  ;;  %p494_p7 = scmp.lt.s32.totalorder %s488_s28, %s488_s28 }
  0x10   :  { %p495_p8 = por %p494_p7, %p493_p6 }
  0x12   :  { %p496_p9 = pnand %p495_p8, %p489_p5 }
  0x14   :  { %499 = shalt.err (!%p496_p9)
}
  0x15   :  { %23 = dma.hbm_to_vmem [thread:$0]  %s621_s0, 32, %s21_s24, [#allocation3]  }
  0x16   :  { %s548_s7 = smov [#allocation7]  }
  0x17   :  { %s44_s8 = sshll.u32 %s548_s7, 4  ;;  %s45_s8 = int_to_ptr.vmem [resolvable:$true] %s44_s8 }
  0x18   :  { %s508_s9 = scalar_lea.vmem %s45_s8, 16  ;;  %s512_s10 = scalar_lea.vmem %s45_s8, 32 }
  0x19   :  { %p509_p10 = scmp.ne.s32.totalorder %s45_s8, %s508_s9  ;;  %p513_p11 = scmp.lt.s32.totalorder %s45_s8, %s45_s8 }
  0x1a   :  { %p514_p12 = scmp.lt.s32.totalorder %s512_s10, %s508_s9 }
  0x1c   :  { %p515_p13 = por %p514_p12, %p513_p11 }
  0x1e   :  { %p516_p0 = pnand %p515_p13, %p509_p10 }
  0x20   :  { %519 = shalt.err (!%p516_p0)
}
  0x21   :  { %47 = dma.hbm_to_vmem [thread:$0]  %s625_s4, 16, %s45_s8, [#allocation6]  }
  0x22   :  { %540 = dma.done.wait [#allocation3], 32  }
  0x23   :  { %541 = vsyncadd [#allocation3], 4294967264 }
  0x24   :  { %542 = dma.done.wait [#allocation6], 80  }
  0x25   :  { %543 = vsyncadd [#allocation6], 4294967216  ;;  %v549_v0 = vmov 0.0   ;;  %vm550_vm0 = vmmov 0   ;;  %vm72_vm1 = vcmask 1043456   ;;  %vm68_vm2 = vcmask 31744  }
  0x26   :  { %437 = vmatprep.subr.mxu0 %v549_v0  ;;  %439 = vmatprep.mubr.msk.f32.mxu0 %vm550_vm0, %v549_v0  ;;  %v60_v1 = vld [vmem:[#allocation5] sm:$0xf]  ;;  %v59_v2 = vld [vmem:[#allocation2] sm:$0x3]  ;;  %v147_v3 = vld [vmem:[%s624_s3 + $0x8] sm:$0xff]  ;;  %vm155_vm3 = vcmask 130048   ;;  %v394_v23 = vlaneseq }
  0x27   :  { %442 = vmatprep.subr.mxu1 %v549_v0  ;;  %446 = vmatprep.mubr.msk.f32.mxu1 %vm550_vm0, %v549_v0  ;;  %v146_v4 = vld [vmem:[%s624_s3] sm:$0xff]  ;;  %v236_v9 = vld [vmem:[%s626_s5 + $0x8] sm:$0xff]  ;;  %v238_v10 = vld [vmem:[%s626_s5 + $0x18] sm:$0xff]  ;;  %vm239_vm4 = vcmask 64512   ;;  %v551_v21 = vmov 1983009808  }
  0x28   :  { %438 = vmatpush3.msk.msra.mxu0 %vm72_vm1, %v60_v1  ;;  %443 = vmatpush3.msra.mxu1 %v147_v3  ;;  %v424_v5 = vld [vmem:[%s623_s2] ss:$0 sm:$0xff]  ;;  %v237_v12 = vld [vmem:[%s626_s5 + $0x10] sm:$0xff]  ;;  %v427_v13 = vld [vmem:[#allocation7] ss:$0 sm:$0xff]  ;;  %v392_v22 = vunpack.c.l.s4 %v551_v21  ;;  %v395_v25 = vshrl.u32 %v394_v23, 7 }
  0x29   :  { %440 = vmatmul.mubr.msk.f32.vlgmr.msra.gmra.mxu0 %vm68_vm2, %v59_v2  ;;  %444 = vmatprep.subr.mxu1 %v549_v0  ;;  %v235_v11 = vld [vmem:[%s626_s5] sm:$0xff]  ;;  %s552_s5 = smov [#allocation8]  }
  0x2a   :  { %307 = vmatprep.mubr.f32.mxu0 %v549_v0  ;;  %445 = vmatpush3.msra.mxu1 %v146_v4  ;;  %v393_v24 = vunpack.c.0.s8 %v392_v22  ;;  %s414_s22 = sshll.u32 %s552_s5, 4  ;;  %s415_s22 = int_to_ptr.vmem [resolvable:$true] %s414_s22 }
  0x2b   :  { %273 = vmatprep.subr.mxu0 %v236_v9  ;;  %344 = vmatprep.subr.mxu1 %v238_v10  ;;  %s520_s23 = scalar_lea.vmem %s415_s22, 128  ;;  %p525_p2 = scmp.lt.s32.totalorder %s415_s22, %s415_s22 }
  0x2c   :  { %274 = vmatpush1.msra.mxu0 %v235_v11  ;;  %v396_v28 = vsub.s32 %v393_v24, %v395_v25  ;;  %p521_p1 = scmp.ne.s32.totalorder %s415_s22, %s520_s23  ;;  %p526_p3 = scmp.lt.s32.totalorder %s520_s23, %s520_s23 }
  0x2e   :  { %p527_p4 = por %p526_p3, %p525_p2 }
  0x30   :  { %p528_p5 = pnand %p527_p4, %p521_p1 }
  0xe9   :  { %v142_v6 = vpop.f32.mrf.mxu0 }
  0xea   :  { %v143_v7 = vadd.f32 %v424_v5, %v142_v6 }
  0xeb   :  { %v441_v8 = vpop.f32.mrf.mxu0 }
  0xec   :  { %447 = vmatmul.mubr.msk.f32.vlgmr.msra.gmra.mxu1 %vm155_vm3, %v143_v7 }
  0xed   :  { %378 = vmatprep.mubr.f32.mxu1 %v549_v0  ;;  %345 = vmatpush1.msra.mxu1 %v237_v12 }
 0x1ac   :  { %v225_v14 = vpop.f32.mrf.mxu1 }
 0x1ad   :  { %v226_v15 = vadd.f32 %v427_v13, %v225_v14 }
 0x1ae   :  { %v448_v16 = vpop.f32.mrf.mxu1 }
 0x1af   :  { %v429_v17 = vmul.f32 -1.442695, %v226_v15 }
 0x1b1   :  { %456 = vpow2.f32 %v429_v17 }
 0x1be   :  { %v457_v18 = vpop.eup %456 }
 0x1bf   :  { %v232_v19 = vadd.f32 1.0, %v457_v18 }
 0x1c1   :  { %458 = vrcp.f32 %v232_v19 }
 0x1ce   :  { %v459_v20 = vpop.eup %458 }
 0x1cf   :  { %430 = vmatmul.mubr.msk.f32.vlgmr.msra.gmra.mxu0 %vm239_vm4, %v459_v20  ;;  %431 = vmatmul.mubr.msk.f32.vlgmr.msra.gmra.mxu1 %vm239_vm4, %v459_v20 }
 0x28f   :  { %v309_v26 = vpop.f32.mrf.mxu0  ;;  %v380_v27 = vpop.f32.mrf.mxu1 }
 0x291   :  { %v311_v29 = vpop.f32.mrf.mxu0  ;;  %v382_v30 = vpop.f32.mrf.mxu1 }
 0x292   :  { %v389_v31 = vcombine.low %v309_v26, %v311_v29  ;;  %v390_v32 = vcombine.low %v380_v27, %v382_v30 }
 0x294   :  { %v397_v33 = vrot.slane %v389_v31, %v396_v28  ;;  %v404_v34 = vrot.slane %v390_v32, %v396_v28 }
 0x296   :  { %v405_v35 = vcombine.low %v397_v33, %v404_v34 }
 0x298   :  { %407 = vst [vmem:[#allocation8] sm:$0xff] %v405_v35 }
 0x299   :  { %531 = shalt.err (!%p528_p5)
}
 0x29a   :  { %417 = dma.vmem_to_hbm [thread:$0]  %s415_s22, 128, %s627_s6, [#allocation4]  }
 0x29b   :  { %544 = dma.done.wait [#allocation4], 128  }
 0x29c   :  { %545 = vsyncadd [#allocation4], 4294967168 }
 0x29d   :  { %421 = vsyncpa [#allocation3], 1 }
 0x29e   :  { %422 = vsyncpa [#allocation6], 1 }
 0x29f   :  { %423 = vsyncpa [#allocation4], 1 }

</bundles_post_ra>
